<compile_context>
chip_gen: v5e
topology: v5e:2x2
jax: 0.10.0
libtpu: 0.0.40
codegen_flags: <defaults>
</compile_context>

<pallas_src>
import functools

import jax
import jax.numpy as jnp
from jax import lax
from jax.experimental import pallas as pl
from jax.experimental.pallas import tpu as pltpu


def _attention_kernel(v_ref, k_ref, q_ref, mask_ref,
                      wv_ref, wk_ref, wq_ref, wfc_ref, bfc_ref,
                      o_ref):
    f32 = jnp.float32
    bf16 = jnp.bfloat16

    B, H, Lv, hd = v_ref.shape
    Lk = k_ref.shape[2]
    Lq = q_ref.shape[2]
    E = o_ref.shape[-1]
    BH = B * H

    # Heads are on a leading axis, so merging them into the batch axis is a pure
    # re-indexing of vregs (minor (L, hd) dims untouched) -- no lane slicing anywhere.
    v = v_ref[...].reshape(BH, Lv, hd)          # bf16
    k = k_ref[...].reshape(BH, Lk, hd)          # bf16
    q = q_ref[...].reshape(BH, Lq, hd)          # bf16

    proj_dn = (((2,), (0,)), ((), ()))          # contract head_dim with W^T rows
    nt_dn = (((2,), (2,)), ((0,), (0,)))        # q.k^T (NT), batched over (batch*head)
    nn_dn = (((2,), (1,)), ((0,), (0,)))        # attn.v, batched over (batch*head)
    fc_dn = (((2,), (0,)), ((), ()))            # ctx_h . Wfc_h

    # --- projections: ONE bf16 MXU matmul per tensor for all batches and heads
    #     (the per-head nn.Linear weight is shared; 1/sqrt(E) is folded into wq).
    vp = lax.dot_general(v, wv_ref[...], proj_dn, preferred_element_type=f32)  # (BH, Lv, hd)
    kp = lax.dot_general(k, wk_ref[...], proj_dn, preferred_element_type=f32)  # (BH, Lk, hd)
    qp = lax.dot_general(q, wq_ref[...], proj_dn, preferred_element_type=f32)  # (BH, Lq, hd)

    # --- mask -> additive f32 bias, once per grid step, broadcast across heads
    #     (leading-dim broadcast + leading-dim reshape only).
    mf = mask_ref[...].astype(f32)                                  # (B, Lq, Lk)
    bias = jnp.where(mf == 0.0, f32(-1e20), f32(0.0))               # (B, Lq, Lk)
    bias = jnp.broadcast_to(bias[:, None, :, :], (B, H, Lq, Lk)).reshape(BH, Lq, Lk)

    # --- scores: ONE batched NT matmul over all (batch, head) pairs.
    energy = lax.dot_general(qp.astype(bf16), kp.astype(bf16), nt_dn,
                             preferred_element_type=f32)            # (BH, Lq, Lk)
    logits = energy + bias

    # --- softmax strictly in f32 on the VPU (v5e has no bf16 VPU/EUP); exact divide.
    m = jnp.max(logits, axis=-1, keepdims=True)
    e = jnp.exp(logits - m)
    attn = e / jnp.sum(e, axis=-1, keepdims=True)                   # (BH, Lq, Lk) f32

    # --- context: ONE batched matmul.
    ctx = lax.dot_general(attn.astype(bf16), vp.astype(bf16), nn_dn,
                          preferred_element_type=f32)               # (BH, Lq, hd)
    ctx = ctx.reshape(B, H, Lq, hd)                                 # leading-dim split only

    # --- fc_out with the head concat folded in:
    #     concat(heads) @ Wfc^T == sum_h ctx_h @ Wfc^T[h*hd:(h+1)*hd, :].
    # Indexing the LEADING head axis is free; `H` is a small static trip count.
    wfc = wfc_ref[...]                                              # (H, hd, E) bf16
    out = jnp.zeros((B, Lq, E), f32)
    for h in range(H):
        out = out + lax.dot_general(ctx[:, h].astype(bf16), wfc[h], fc_dn,
                                    preferred_element_type=f32)     # (B, Lq, E)
    out = out + bfc_ref[...]                                        # (1, E) f32 broadcast

    o_ref[...] = out.astype(o_ref.dtype)


def _round_up(x, m):
    return -(-x // m) * m


def _padded_bytes(shape, dtype):
    """Bytes an array occupies in VMEM once its minor dims are padded to the
    native (sublane, 128-lane) tile for its dtype."""
    itemsize = jnp.dtype(dtype).itemsize
    sublanes = {4: 8, 2: 16, 1: 32}[itemsize]
    dims = list(shape)
    dims[-1] = _round_up(dims[-1], 128)
    if len(dims) >= 2:
        dims[-2] = _round_up(dims[-2], sublanes)
    n = itemsize
    for d in dims:
        n *= d
    return n


def _vmem_need_bytes(bb, heads, q_len, k_len, v_len, head_dim, embed):
    """Per-grid-step VMEM estimate: double-buffered pipeline blocks + weights +
    in-kernel temporaries (the old estimate ignored the last two entirely)."""
    bh = bb * heads
    bf16, f32, i8 = jnp.bfloat16, jnp.float32, jnp.int8
    l_max = max(q_len, k_len)
    pipeline = 2 * (  # Pallas double-buffers every block
        _padded_bytes((bh, q_len, head_dim), bf16)
        + _padded_bytes((bh, k_len, head_dim), bf16)
        + _padded_bytes((bh, v_len, head_dim), bf16)
        + _padded_bytes((bb, q_len, k_len), i8)                 # mask
        + _padded_bytes((bb, q_len, embed), f32)                # output block
        + 3 * _padded_bytes((head_dim, head_dim), bf16)         # Wq/Wk/Wv
        + heads * _padded_bytes((head_dim, embed), bf16)        # Wfc per head
        + _padded_bytes((1, embed), f32)                        # b_fc
    )
    temps = (
        3 * (_padded_bytes((bh, l_max, head_dim), f32)
             + _padded_bytes((bh, l_max, head_dim), bf16))      # qp/kp/vp + bf16 copies
        + 5 * _padded_bytes((bh, q_len, k_len), f32)            # bias/energy/logits/e/attn
        + _padded_bytes((bh, q_len, k_len), bf16)               # attn bf16
        + 2 * _padded_bytes((bh, q_len, head_dim), f32)         # ctx + slack
        + 2 * _padded_bytes((bb, q_len, embed), f32)            # fc accumulator + store
    )
    return pipeline + int(1.25 * temps)                         # regalloc / spill headroom


def _pick_batch_block(n, need_fn, vmem_budget_bytes, min_grid_steps):
    """Largest divisor of n whose estimated VMEM footprint fits the budget while
    keeping at least `min_grid_steps` grid steps (v7x megacore + DMA pipelining)."""
    steps_floor = min(min_grid_steps, n)
    best = 1
    for bb in range(1, n + 1):
        if n % bb:
            continue
        if n // bb < steps_floor:
            continue
        if need_fn(bb) <= vmem_budget_bytes:
            best = bb
    return best


def self_attention_pallas(values, keys, query, mask, params, *, heads,
                          batch_block=None,
                          vmem_budget_bytes=32 * 1024 * 1024,
                          min_grid_steps=4):
    """values/keys/query: (N, L, E) float32; mask: (N, Lq, Lk), 0 = masked out.

    vmem_budget_bytes: 32 MiB is safe on every generation (v7x scoped default);
    on v6e (128 MiB physical VMEM) raise it to 64-96 MiB so _pick_batch_block can
    choose larger batch blocks.
    """
    N, v_len, E = values.shape
    k_len = keys.shape[1]
    q_len = query.shape[1]
    head_dim = E // heads
    assert head_dim * heads == E, "embed_size must be divisible by heads"
    assert k_len == v_len

    f32, bf16 = jnp.float32, jnp.bfloat16
    scale = 1.0 / (E ** 0.5)

    def split_heads(x):
        # (N, L, E) -> (N, heads, L, head_dim): heads on a LEADING axis so the
        # kernel never slices the lane dim; bf16 halves activation DMA + feeds MXU.
        n, l, _ = x.shape
        return x.reshape(n, l, heads, head_dim).transpose(0, 2, 1, 3).astype(bf16)

    v4 = split_heads(values)
    k4 = split_heads(keys)
    q4 = split_heads(query)
    mask_i8 = mask.astype(jnp.int8)

    # nn.Linear computes y = x @ W.T (weight shared across heads); scale folded into Wq.
    wv_t = params["w_values"].T.astype(bf16)                            # (hd, hd)
    wk_t = params["w_keys"].T.astype(bf16)                              # (hd, hd)
    wq_t = (params["w_queries"].T * scale).astype(bf16)                 # (hd, hd), scaled
    wfc_t = params["w_fc"].T.reshape(heads, head_dim, E).astype(bf16)   # (H, hd, E)
    bfc = params["b_fc"].reshape(1, E).astype(f32)

    if batch_block is None:
        need = functools.partial(_vmem_need_bytes, heads=heads, q_len=q_len,
                                 k_len=k_len, v_len=v_len, head_dim=head_dim,
                                 embed=E)
        batch_block = _pick_batch_block(N, need, int(0.9 * vmem_budget_bytes),
                                        min_grid_steps)
    assert N % batch_block == 0
    bb = batch_block

    grid_spec = pltpu.PrefetchScalarGridSpec(
        num_scalar_prefetch=0,
        grid=(N // bb,),
        in_specs=[
            pl.BlockSpec((bb, heads, v_len, head_dim), lambda n: (n, 0, 0, 0)),   # values
            pl.BlockSpec((bb, heads, k_len, head_dim), lambda n: (n, 0, 0, 0)),   # keys
            pl.BlockSpec((bb, heads, q_len, head_dim), lambda n: (n, 0, 0, 0)),   # query
            pl.BlockSpec((bb, q_len, k_len), lambda n: (n, 0, 0)),                # mask (int8)
            pl.BlockSpec((head_dim, head_dim), lambda n: (0, 0)),                 # Wv^T
            pl.BlockSpec((head_dim, head_dim), lambda n: (0, 0)),                 # Wk^T
            pl.BlockSpec((head_dim, head_dim), lambda n: (0, 0)),                 # Wq^T * scale
            pl.BlockSpec((heads, head_dim, E), lambda n: (0, 0, 0)),              # Wfc^T per head
            pl.BlockSpec((1, E), lambda n: (0, 0)),                               # b_fc
        ],
        out_specs=pl.BlockSpec((bb, q_len, E), lambda n: (n, 0, 0)),
    )

    return pl.pallas_call(
        _attention_kernel,
        out_shape=jax.ShapeDtypeStruct((N, q_len, E), f32),
        grid_spec=grid_spec,
        compiler_params=pltpu.CompilerParams(
            dimension_semantics=("parallel",),
            vmem_limit_bytes=int(vmem_budget_bytes),
        ),
    )(v4, k4, q4, mask_i8, wv_t, wk_t, wq_t, wfc_t, bfc)


def self_attention_ref(values, keys, query, mask, params, *, heads):
    """Pure-JAX f32 reference mirroring the PyTorch module."""
    N, v_len, E = values.shape
    k_len, q_len = keys.shape[1], query.shape[1]
    hd = E // heads
    v = values.reshape(N, v_len, heads, hd) @ params["w_values"].T
    k = keys.reshape(N, k_len, heads, hd) @ params["w_keys"].T
    q = query.reshape(N, q_len, heads, hd) @ params["w_queries"].T
    energy = jnp.einsum("nqhd,nkhd->nhqk", q, k)
    energy = jnp.where(mask[:, None, :, :] == 0, -1e20, energy)
    attn = jax.nn.softmax(energy / (E ** 0.5), axis=3)
    out = jnp.einsum("nhql,nlhd->nqhd", attn, v).reshape(N, q_len, E)
    return out @ params["w_fc"].T + params["b_fc"]


if __name__ == "__main__":
    N, seq, embed_size, heads = 2, 8, 32, 2
    head_dim = embed_size // heads

    key = jax.random.PRNGKey(0)
    ks = jax.random.split(key, 8)

    values = jax.random.normal(ks[0], (N, seq, embed_size), dtype=jnp.float32)
    keys_in = jax.random.normal(ks[1], (N, seq, embed_size), dtype=jnp.float32)
    query = jax.random.normal(ks[2], (N, seq, embed_size), dtype=jnp.float32)
    # Causal 0/1 mask, broadcast over heads (matches masked_fill(mask==0, -1e20)).
    mask = jnp.tril(jnp.ones((seq, seq), dtype=jnp.int32))[None].repeat(N, axis=0)

    params = {
        # nn.Linear weight layout: (out_features, in_features)
        "w_values":  0.1 * jax.random.normal(ks[3], (head_dim, head_dim), jnp.float32),
        "w_keys":    0.1 * jax.random.normal(ks[4], (head_dim, head_dim), jnp.float32),
        "w_queries": 0.1 * jax.random.normal(ks[5], (head_dim, head_dim), jnp.float32),
        "w_fc":      0.1 * jax.random.normal(ks[6], (embed_size, embed_size), jnp.float32),
        "b_fc":      0.1 * jax.random.normal(ks[7], (embed_size,), jnp.float32),
    }

    out = self_attention_pallas(values, keys_in, query, mask, params, heads=heads)
    out = jax.block_until_ready(out)

    ref = self_attention_ref(values, keys_in, query, mask, params, heads=heads)
    assert out.shape == (N, seq, embed_size)
    # Tolerance is set by bf16 MXU operands (softmax itself is exact f32, exact divide).
    assert jnp.allclose(out, ref, atol=2e-2, rtol=2e-2), "mismatch vs reference"

    print("KERNEL_OK")
</pallas_src>

<mosaic_0001>
module attributes {stable_mosaic.version = 11 : i64} {
  func.func @_attention_kernel(%arg0: i32, %arg1: memref<1x2x8x16xbf16, #tpu.memory_space<vmem>>, %arg2: memref<1x2x8x16xbf16, #tpu.memory_space<vmem>>, %arg3: memref<1x2x8x16xbf16, #tpu.memory_space<vmem>>, %arg4: memref<1x8x8xi8, #tpu.memory_space<vmem>>, %arg5: memref<16x16xbf16, #tpu.memory_space<vmem>>, %arg6: memref<16x16xbf16, #tpu.memory_space<vmem>>, %arg7: memref<16x16xbf16, #tpu.memory_space<vmem>>, %arg8: memref<2x16x32xbf16, #tpu.memory_space<vmem>>, %arg9: memref<1x32xf32, #tpu.memory_space<vmem>>, %arg10: memref<1x8x32xf32, #tpu.memory_space<vmem>>) attributes {dimension_semantics = [#tpu.dimension_semantics<parallel>], iteration_bounds = array<i64: 2>, scalar_prefetch = 0 : i64, scratch_operands = 0 : i64, tpu.core_type = #tpu.core_type<tc>, window_params = [{transform_indices = @transform_0, window_bounds = array<i64: 1, 2, 8, 16>}, {transform_indices = @transform_1, window_bounds = array<i64: 1, 2, 8, 16>}, {transform_indices = @transform_2, window_bounds = array<i64: 1, 2, 8, 16>}, {transform_indices = @transform_3, window_bounds = array<i64: 1, 8, 8>}, {pipeline_mode = #tpu.pipeline_mode<synchronous>, transform_indices = @transform_4, window_bounds = array<i64: 16, 16>}, {pipeline_mode = #tpu.pipeline_mode<synchronous>, transform_indices = @transform_5, window_bounds = array<i64: 16, 16>}, {pipeline_mode = #tpu.pipeline_mode<synchronous>, transform_indices = @transform_6, window_bounds = array<i64: 16, 16>}, {pipeline_mode = #tpu.pipeline_mode<synchronous>, transform_indices = @transform_7, window_bounds = array<i64: 2, 16, 32>}, {pipeline_mode = #tpu.pipeline_mode<synchronous>, transform_indices = @transform_8, window_bounds = array<i64: 1, 32>}, {transform_indices = @transform_9, window_bounds = array<i64: 1, 8, 32>}]} {
    %c0 = arith.constant 0 : index
    %c0_0 = arith.constant 0 : index
    %c0_1 = arith.constant 0 : index
    %c0_2 = arith.constant 0 : index
    %0 = vector.load %arg1[%c0, %c0_0, %c0_1, %c0_2] : memref<1x2x8x16xbf16, #tpu.memory_space<vmem>>, vector<1x2x8x16xbf16>
    %1 = vector.shape_cast %0 : vector<1x2x8x16xbf16> to vector<2x8x16xbf16>
    %c0_3 = arith.constant 0 : index
    %c0_4 = arith.constant 0 : index
    %c0_5 = arith.constant 0 : index
    %c0_6 = arith.constant 0 : index
    %2 = vector.load %arg2[%c0_3, %c0_4, %c0_5, %c0_6] : memref<1x2x8x16xbf16, #tpu.memory_space<vmem>>, vector<1x2x8x16xbf16>
    %3 = vector.shape_cast %2 : vector<1x2x8x16xbf16> to vector<2x8x16xbf16>
    %c0_7 = arith.constant 0 : index
    %c0_8 = arith.constant 0 : index
    %c0_9 = arith.constant 0 : index
    %c0_10 = arith.constant 0 : index
    %4 = vector.load %arg3[%c0_7, %c0_8, %c0_9, %c0_10] : memref<1x2x8x16xbf16, #tpu.memory_space<vmem>>, vector<1x2x8x16xbf16>
    %5 = vector.shape_cast %4 : vector<1x2x8x16xbf16> to vector<2x8x16xbf16>
    %c0_11 = arith.constant 0 : index
    %c0_12 = arith.constant 0 : index
    %6 = vector.load %arg5[%c0_11, %c0_12] : memref<16x16xbf16, #tpu.memory_space<vmem>>, vector<16x16xbf16>
    %cst = arith.constant dense<0.000000e+00> : vector<2x8x16xf32>
    %7 = tpu.matmul %1, %6, %cst {dimension_numbers = #tpu.dot_dimension_numbers<[2], [0], [0, 1], [1], [0, 0, 0, 1, 1, 1], [], []>} : vector<2x8x16xbf16>, vector<16x16xbf16>, vector<2x8x16xf32> -> vector<2x8x16xf32>
    %c0_13 = arith.constant 0 : index
    %c0_14 = arith.constant 0 : index
    %8 = vector.load %arg6[%c0_13, %c0_14] : memref<16x16xbf16, #tpu.memory_space<vmem>>, vector<16x16xbf16>
    %cst_15 = arith.constant dense<0.000000e+00> : vector<2x8x16xf32>
    %9 = tpu.matmul %3, %8, %cst_15 {dimension_numbers = #tpu.dot_dimension_numbers<[2], [0], [0, 1], [1], [0, 0, 0, 1, 1, 1], [], []>} : vector<2x8x16xbf16>, vector<16x16xbf16>, vector<2x8x16xf32> -> vector<2x8x16xf32>
    %c0_16 = arith.constant 0 : index
    %c0_17 = arith.constant 0 : index
    %10 = vector.load %arg7[%c0_16, %c0_17] : memref<16x16xbf16, #tpu.memory_space<vmem>>, vector<16x16xbf16>
    %cst_18 = arith.constant dense<0.000000e+00> : vector<2x8x16xf32>
    %11 = tpu.matmul %5, %10, %cst_18 {dimension_numbers = #tpu.dot_dimension_numbers<[2], [0], [0, 1], [1], [0, 0, 0, 1, 1, 1], [], []>} : vector<2x8x16xbf16>, vector<16x16xbf16>, vector<2x8x16xf32> -> vector<2x8x16xf32>
    %c0_19 = arith.constant 0 : index
    %c0_20 = arith.constant 0 : index
    %c0_21 = arith.constant 0 : index
    %12 = vector.load %arg4[%c0_19, %c0_20, %c0_21] : memref<1x8x8xi8, #tpu.memory_space<vmem>>, vector<1x8x8xi8>
    %13 = arith.sitofp %12 : vector<1x8x8xi8> to vector<1x8x8xf32>
    %cst_22 = arith.constant 0.000000e+00 : f32
    %14 = vector.broadcast %cst_22 : f32 to vector<1x8x8xf32>
    %15 = arith.cmpf oeq, %13, %14 : vector<1x8x8xf32>
    %cst_23 = arith.constant -1.000000e+20 : f32
    %cst_24 = arith.constant 0.000000e+00 : f32
    %16 = vector.broadcast %cst_23 : f32 to vector<1x8x8xf32>
    %17 = vector.broadcast %cst_24 : f32 to vector<1x8x8xf32>
    %18 = arith.select %15, %16, %17 : vector<1x8x8xi1>, vector<1x8x8xf32>
    %19 = vector.shape_cast %18 : vector<1x8x8xf32> to vector<1x1x8x8xf32>
    %20 = vector.shape_cast %19 : vector<1x1x8x8xf32> to vector<1x1x8x8xf32>
    %21 = vector.broadcast %20 : vector<1x1x8x8xf32> to vector<1x2x8x8xf32>
    %22 = vector.shape_cast %21 : vector<1x2x8x8xf32> to vector<2x8x8xf32>
    %23 = arith.truncf %11 : vector<2x8x16xf32> to vector<2x8x16xbf16>
    %24 = arith.truncf %9 : vector<2x8x16xf32> to vector<2x8x16xbf16>
    %cst_25 = arith.constant dense<0.000000e+00> : vector<2x8x8xf32>
    %25 = tpu.matmul %23, %24, %cst_25 {dimension_numbers = #tpu.dot_dimension_numbers<[2], [2], [1], [1], [0, 0, 0, 1, 1, 1], [0], [0]>} : vector<2x8x16xbf16>, vector<2x8x16xbf16>, vector<2x8x8xf32> -> vector<2x8x8xf32>
    %26 = arith.addf %25, %22 : vector<2x8x8xf32>
    %cst_26 = arith.constant dense<0xFF800000> : vector<2x8xf32>
    %27 = vector.multi_reduction <maximumf>, %26, %cst_26 [2] : vector<2x8x8xf32> to vector<2x8xf32>
    %28 = vector.shape_cast %27 : vector<2x8xf32> to vector<2x8x1xf32>
    %29 = vector.broadcast %28 : vector<2x8x1xf32> to vector<2x8x8xf32>
    %30 = arith.subf %26, %29 : vector<2x8x8xf32>
    %31 = math.exp %30 : vector<2x8x8xf32>
    %cst_27 = arith.constant dense<0.000000e+00> : vector<2x8xf32>
    %32 = vector.multi_reduction <add>, %31, %cst_27 [2] : vector<2x8x8xf32> to vector<2x8xf32>
    %33 = vector.shape_cast %32 : vector<2x8xf32> to vector<2x8x1xf32>
    %34 = vector.broadcast %33 : vector<2x8x1xf32> to vector<2x8x8xf32>
    %35 = arith.divf %31, %34 : vector<2x8x8xf32>
    %36 = arith.truncf %35 : vector<2x8x8xf32> to vector<2x8x8xbf16>
    %37 = arith.truncf %7 : vector<2x8x16xf32> to vector<2x8x16xbf16>
    %cst_28 = arith.constant dense<0.000000e+00> : vector<2x8x16xf32>
    %38 = tpu.matmul %36, %37, %cst_28 {dimension_numbers = #tpu.dot_dimension_numbers<[2], [1], [1], [2], [0, 0, 0, 1, 1, 2], [0], [0]>} : vector<2x8x8xbf16>, vector<2x8x16xbf16>, vector<2x8x16xf32> -> vector<2x8x16xf32>
    %39 = vector.shape_cast %38 : vector<2x8x16xf32> to vector<1x2x8x16xf32>
    %c0_29 = arith.constant 0 : index
    %c0_30 = arith.constant 0 : index
    %c0_31 = arith.constant 0 : index
    %40 = vector.load %arg8[%c0_29, %c0_30, %c0_31] : memref<2x16x32xbf16, #tpu.memory_space<vmem>>, vector<2x16x32xbf16>
    %cst_32 = arith.constant 0.000000e+00 : f32
    %41 = vector.broadcast %cst_32 : f32 to vector<1x8x32xf32>
    %42 = vector.extract_strided_slice %39 {offsets = [0, 0, 0, 0], sizes = [1, 1, 8, 16], strides = [1, 1, 1, 1]} : vector<1x2x8x16xf32> to vector<1x1x8x16xf32>
    %43 = vector.shape_cast %42 : vector<1x1x8x16xf32> to vector<1x8x16xf32>
    %44 = arith.truncf %43 : vector<1x8x16xf32> to vector<1x8x16xbf16>
    %45 = vector.extract_strided_slice %40 {offsets = [0, 0, 0], sizes = [1, 16, 32], strides = [1, 1, 1]} : vector<2x16x32xbf16> to vector<1x16x32xbf16>
    %46 = vector.shape_cast %45 : vector<1x16x32xbf16> to vector<16x32xbf16>
    %cst_33 = arith.constant dense<0.000000e+00> : vector<1x8x32xf32>
    %47 = tpu.matmul %44, %46, %cst_33 {dimension_numbers = #tpu.dot_dimension_numbers<[2], [0], [0, 1], [1], [0, 0, 0, 1, 1, 1], [], []>} : vector<1x8x16xbf16>, vector<16x32xbf16>, vector<1x8x32xf32> -> vector<1x8x32xf32>
    %48 = arith.addf %41, %47 : vector<1x8x32xf32>
    %49 = vector.extract_strided_slice %39 {offsets = [0, 1, 0, 0], sizes = [1, 1, 8, 16], strides = [1, 1, 1, 1]} : vector<1x2x8x16xf32> to vector<1x1x8x16xf32>
    %50 = vector.shape_cast %49 : vector<1x1x8x16xf32> to vector<1x8x16xf32>
    %51 = arith.truncf %50 : vector<1x8x16xf32> to vector<1x8x16xbf16>
    %52 = vector.extract_strided_slice %40 {offsets = [1, 0, 0], sizes = [1, 16, 32], strides = [1, 1, 1]} : vector<2x16x32xbf16> to vector<1x16x32xbf16>
    %53 = vector.shape_cast %52 : vector<1x16x32xbf16> to vector<16x32xbf16>
    %cst_34 = arith.constant dense<0.000000e+00> : vector<1x8x32xf32>
    %54 = tpu.matmul %51, %53, %cst_34 {dimension_numbers = #tpu.dot_dimension_numbers<[2], [0], [0, 1], [1], [0, 0, 0, 1, 1, 1], [], []>} : vector<1x8x16xbf16>, vector<16x32xbf16>, vector<1x8x32xf32> -> vector<1x8x32xf32>
    %55 = arith.addf %48, %54 : vector<1x8x32xf32>
    %c0_35 = arith.constant 0 : index
    %c0_36 = arith.constant 0 : index
    %56 = vector.load %arg9[%c0_35, %c0_36] : memref<1x32xf32, #tpu.memory_space<vmem>>, vector<1x32xf32>
    %57 = vector.shape_cast %56 : vector<1x32xf32> to vector<1x1x32xf32>
    %58 = vector.broadcast %57 : vector<1x1x32xf32> to vector<1x8x32xf32>
    %59 = arith.addf %55, %58 : vector<1x8x32xf32>
    %c0_37 = arith.constant 0 : index
    %c0_38 = arith.constant 0 : index
    %c0_39 = arith.constant 0 : index
    %60 = vector.load %arg10[%c0_37, %c0_38, %c0_39] : memref<1x8x32xf32, #tpu.memory_space<vmem>>, vector<1x8x32xf32>
    tpu.vector_store %arg10[%c0_37, %c0_38, %c0_39], %59 {strides = array<i32>} : memref<1x8x32xf32, #tpu.memory_space<vmem>>, vector<1x8x32xf32>,
    return
  }
  func.func @transform_0(%arg0: i32) -> (i32, i32, i32, i32) {
    %c0_i32 = arith.constant 0 : i32
    %c0_i32_0 = arith.constant 0 : i32
    %c0_i32_1 = arith.constant 0 : i32
    %c0_i32_2 = arith.constant 0 : i32
    return %arg0, %c0_i32, %c0_i32_0, %c0_i32_1 : i32, i32, i32, i32
  }
  func.func @transform_1(%arg0: i32) -> (i32, i32, i32, i32) {
    %c0_i32 = arith.constant 0 : i32
    %c0_i32_0 = arith.constant 0 : i32
    %c0_i32_1 = arith.constant 0 : i32
    %c0_i32_2 = arith.constant 0 : i32
    return %arg0, %c0_i32, %c0_i32_0, %c0_i32_1 : i32, i32, i32, i32
  }
  func.func @transform_2(%arg0: i32) -> (i32, i32, i32, i32) {
    %c0_i32 = arith.constant 0 : i32
    %c0_i32_0 = arith.constant 0 : i32
    %c0_i32_1 = arith.constant 0 : i32
    %c0_i32_2 = arith.constant 0 : i32
    return %arg0, %c0_i32, %c0_i32_0, %c0_i32_1 : i32, i32, i32, i32
  }
  func.func @transform_3(%arg0: i32) -> (i32, i32, i32) {
    %c0_i32 = arith.constant 0 : i32
    %c0_i32_0 = arith.constant 0 : i32
    %c0_i32_1 = arith.constant 0 : i32
    return %arg0, %c0_i32, %c0_i32_0 : i32, i32, i32
  }
  func.func @transform_4(%arg0: i32) -> (i32, i32) {
    %c0_i32 = arith.constant 0 : i32
    %c0_i32_0 = arith.constant 0 : i32
    %c0_i32_1 = arith.constant 0 : i32
    return %c0_i32, %c0_i32_0 : i32, i32
  }
  func.func @transform_5(%arg0: i32) -> (i32, i32) {
    %c0_i32 = arith.constant 0 : i32
    %c0_i32_0 = arith.constant 0 : i32
    %c0_i32_1 = arith.constant 0 : i32
    return %c0_i32, %c0_i32_0 : i32, i32
  }
  func.func @transform_6(%arg0: i32) -> (i32, i32) {
    %c0_i32 = arith.constant 0 : i32
    %c0_i32_0 = arith.constant 0 : i32
    %c0_i32_1 = arith.constant 0 : i32
    return %c0_i32, %c0_i32_0 : i32, i32
  }
  func.func @transform_7(%arg0: i32) -> (i32, i32, i32) {
    %c0_i32 = arith.constant 0 : i32
    %c0_i32_0 = arith.constant 0 : i32
    %c0_i32_1 = arith.constant 0 : i32
    %c0_i32_2 = arith.constant 0 : i32
    return %c0_i32, %c0_i32_0, %c0_i32_1 : i32, i32, i32
  }
  func.func @transform_8(%arg0: i32) -> (i32, i32) {
    %c0_i32 = arith.constant 0 : i32
    %c0_i32_0 = arith.constant 0 : i32
    %c0_i32_1 = arith.constant 0 : i32
    return %c0_i32, %c0_i32_0 : i32, i32
  }
  func.func @transform_9(%arg0: i32) -> (i32, i32, i32) {
    %c0_i32 = arith.constant 0 : i32
    %c0_i32_0 = arith.constant 0 : i32
    %c0_i32_1 = arith.constant 0 : i32
    return %arg0, %c0_i32, %c0_i32_0 : i32, i32, i32
  }
}

</mosaic_0001>

<bundles_post_ra>
// kernel: tpu_custom_call.1
= control target key start
LH: loop header
LB: loop body
LE: loop exit
PB: predicated region body
PF: predicated region fallthrough
CT: control target
= control target key end

     0   :  { %s1903_s0 = inlined_call_operand.hbm [shape: bf16[2,2,8,16], index: 0, kind: input, shape index: {}]   ;;  %s1904_s1 = inlined_call_operand.hbm [shape: bf16[2,2,8,16], index: 1, kind: input, shape index: {}]   ;;  %s1905_s2 = inlined_call_operand.hbm [shape: bf16[2,2,8,16], index: 2, kind: input, shape index: {}]   ;;  %s1906_s3 = inlined_call_operand.hbm [shape: s8[2,8,8], index: 3, kind: input, shape index: {}]   ;;  %s1907_s4 = inlined_call_operand.hbm [shape: bf16[16,16], index: 4, kind: input, shape index: {}]   ;;  %s1908_s5 = inlined_call_operand.hbm [shape: bf16[16,16], index: 5, kind: input, shape index: {}]   ;;  %s1909_s6 = inlined_call_operand.hbm [shape: bf16[16,16], index: 6, kind: input, shape index: {}]   ;;  %s1910_s7 = inlined_call_operand.hbm [shape: bf16[2,16,32], index: 7, kind: input, shape index: {}]   ;;  %s1911_s8 = inlined_call_operand.vmem [shape: f32[1,32], index: 8, kind: input, shape index: {}]   ;;  %s1912_s9 = inlined_call_operand.hbm [shape: f32[2,8,32], index: 9, kind: output, shape index: {}]  }
   0x1   :  { %1924 = sst [smem:[#allocation29_spill]] %s1904_s1 }
   0x2   :  { %1925 = sst [smem:[#allocation30_spill]] %s1907_s4 }
   0x3   :  { %1926 = sst [smem:[#allocation31_spill]] %s1908_s5 }
   0x4   :  { %1927 = sst [smem:[#allocation32_spill]] %s1909_s6 }
   0x5   :  { %1928 = sst [smem:[#allocation33_spill]] %s1910_s7 }
   0x6   :  { %14 = vsyncpa [#allocation3], 0 }
   0x7   :  { %16 = vsyncpa [#allocation3 + $0x1], 0 }
   0x8   :  { %17 = vsyncpa [#allocation6], 0 }
   0x9   :  { %19 = vsyncpa [#allocation6 + $0x1], 0 }
   0xa   :  { %20 = vsyncpa [#allocation9], 0 }
   0xb   :  { %22 = vsyncpa [#allocation9 + $0x1], 0 }
   0xc   :  { %23 = vsyncpa [#allocation12], 0 }
   0xd   :  { %24 = vsyncpa [#allocation15], 0 }
   0xe   :  { %25 = vsyncpa [#allocation4], 0 }
   0xf   :  { %27 = vsyncpa [#allocation4 + $0x1], 0  ;;  %s1606_s30 = smov 0   ;;  %s1608_s10 = smov 0  }
  0x10   :  { %s1610_s11 = smov 0   ;;  %s1612_s12 = smov 0  }
  0x11 LB: > { %1929 = sst [smem:[#allocation24_spill]] %s1535_s30  ;;  %s1627_s13 = sadd.s32 4294967295, %s1547_s12   ;;  %s1547_s12 = sphi %s1612_s12, %s1957_s12   ;;  %s1543_s11 = sphi %s1610_s11, %s1959_s11   ;;  %s1539_s10 = sphi %s1608_s10, %s1961_s10   ;;  %s1535_s30 = sphi %s1606_s30, %s1960_s30  }
  0x12   : > { %1930 = sst [smem:[#allocation25_spill]] %s1543_s11  ;;  %s1023_s14 = sadd.s32 4294967294, %s1547_s12  }
  0x13   : > { %p53_p0 = scmp.ne.s32.totalorder %s1539_s10, %s1535_s30  ;;  %p1921_p1 = scmp.eq.s32.totalorder %s1627_s13, 0 }
  0x14   : > { %p260_p2 = scmp.eq.s32.totalorder %s1627_s13, 1  ;;  %p266_p3 = scmp.eq.s32.totalorder %s1023_s14, 1 }
  0x15   : > { %p1636_p4 = por %p1921_p1, %p53_p0  ;;  %p1024_p5 = scmp.ge.s32.totalorder %s1547_s12, 1 }
  0x16   : > { %p1641_p6 = por %p266_p3, %p53_p0  ;;  %p273_p7 = scmp.lt.s32.totalorder %s1547_s12, 3 }
  0x17   : > { %s1934_s4 = sld [smem:[#allocation30_spill]]  ;;  %s1549_s21 = smov [#allocation10]  }
  0x18   : > { %s1932_s16 = scalar_select %p1641_p6, 1, 0 }
  0x19   : > { %p1649_p8 = pnand %p1024_p5, %p273_p7  ;;  %s286_s22 = sshll.u32 %s1549_s21, 4  ;;  %s287_s22 = int_to_ptr.vmem [resolvable:$true] %s286_s22 }
  0x1a   : > { %1933 = sst [smem:[#allocation26_spill]] %s1932_s16  ;;  %s1913_s27 = smov 64  }
  0x1b   : > { %p1133_p9 = pneg %p1649_p8  ;;  %s1937_s5 = sld [smem:[#allocation31_spill]] }
  0x1c   : > { %s1915_s28 = smov 4   ;;  %s1552_s29 = smov [#allocation11]  }
  0x1d   : > { %s284_s19 = sshll.u32 %s1934_s4, 4  ;;  %p1657_p10 = pnand %p1133_p9, %p1921_p1  ;;  %s285_s19 = int_to_ptr.hbm [resolvable:$true] %s284_s19 }
  0x1e   : > { %s300_s14 = sshll.u32 %s1552_s29, 4  ;;  %s1676_s17 = sadd.s32 1, %s1547_s12   ;;  %s301_s14 = int_to_ptr.vmem [resolvable:$true] %s300_s14 }
  0x1f   : > { %1136 = dma.hbm_to_vmem [thread:$0]  (!%p1657_p10), %s285_s19, 128, %s287_s22, [#allocation9], %s1913_s27, %s1913_s27, %s1915_s28  }
  0x20   : > { %1938 = sst [smem:[#allocation27_spill]] %s1676_s17  ;;  %s40_s18 = sadd.s32 1, %s1543_s11 }
  0x21   : > { %s298_s26 = sshll.u32 %s1937_s5, 4  ;;  %s37_s21 = ssub.s32 %s1547_s12, %s1676_s17  ;;  %s299_s26 = int_to_ptr.hbm [resolvable:$true] %s298_s26 }
  0x22   : > { %1139 = dma.hbm_to_vmem [thread:$0]  (!%p1657_p10), %s299_s26, 128, %s301_s14, [#allocation12], %s1913_s27, %s1913_s27, %s1915_s28  }
  0x23   : > { %p47_p12 = scmp.ne.s32.totalorder %s1543_s11, %s1539_s10  ;;  %p38_p13 = scmp.eq.s32.totalorder %s37_s21, 0 }
  0x24   : > { %p48_p0 = scmp.eq.s32.totalorder %s1547_s12, 0  ;;  %p1167_p5 = scmp.lt.s32.totalorder %s1547_s12, 2 }
  0x25   : > { %p1686_p3 = por %p260_p2, %p47_p12  ;;  %s1695_s24 = sand.u32 1, %s1543_s11  }
  0x26   : > { %s1692_s22 = scalar_select %p38_p13, %s1543_s11, %s40_s18  }
  0x27   : > { %p49_p7 = por %p48_p0, %p47_p12  ;;  %s1698_s25 = sshll.u32 %s1695_s24, 3 }
  0x28   : > { %1940 = sst [smem:[#allocation28_spill]] %s1692_s22  ;;  %s1701_s26 = sshll.u32 %s1547_s12, 3 }
  0x29   : > { %p1703_p9 = pnand %p1167_p5, %p49_p7  ;;  %s1922_s14 = sand.u32 1, %s1547_s12  }
  0x2a   : > { %s1942_s1 = sld [smem:[#allocation29_spill]]  ;;  %s371_s4 = scalar_lea.vmem [#allocation5], %s1698_s25 }
  0x2b   : > { %s379_s5 = sshll.u32 %s371_s4, 4  ;;  %s1715_s22 = scalar_lea.sflag [#allocation6], %s1922_s14  ;;  %s380_s5 = int_to_ptr.vmem [resolvable:$true] %s379_s5 }
  0x2c   : > { %p1285_p12 = pneg %p1703_p9 }
  0x30   : > { %s376_s27 = scalar_lea.hbm %s1942_s1, %s1701_s26 }
  0x31   : > { %s377_s28 = sshll.u32 %s376_s27, 4  ;;  %s1288_s27 = scalar_lea.hbm %s1942_s1, 16  ;;  %s378_s28 = int_to_ptr.hbm [resolvable:$true] %s377_s28 }
  0x32   : > { %s1281_s11 = sshra.s32 %s378_s28, 4  ;;  %s1282_s11 = int_to_ptr.hbm [resolvable:$true] %s1281_s11 }
  0x33   : > { %s1283_s17 = scalar_lea.hbm %s1282_s11, 8  ;;  %p1289_p5 = scmp.lt.s32.totalorder %s1282_s11, %s1942_s1 }
  0x34   : > { %p1284_p2 = scmp.ne.s32.totalorder %s1282_s11, %s1283_s17  ;;  %p1290_p7 = scmp.lt.s32.totalorder %s1288_s27, %s1283_s17 }
  0x36   : > { %p1286_p13 = pnand %p1285_p12, %p1284_p2  ;;  %p1291_p11 = por %p1290_p7, %p1289_p5 }
  0x38   : > { %p1287_p0 = pneg %p1286_p13 }
  0x3a   : > { %p1292_p1 = pnand %p1291_p11, %p1287_p0 }
  0x3c   : > { %1295 = shalt.err (!%p1292_p1)
}
  0x3d   : > { %s1943_s14 = smov 4   ;;  %s1944_s30 = smov 64  }
  0x3e   : > { %1152 = dma.hbm_to_vmem [thread:$0]  (!%p1703_p9), %s378_s28, 128, %s380_s5, %s1715_s22, %s1944_s30, %s1944_s30, %s1943_s14  }
  0x3f   : > { %s1945_s6 = sld [smem:[#allocation32_spill]]  ;;  %s1553_s11 = smov [#allocation13]  }
  0x40   : > { %s314_s17 = sshll.u32 %s1553_s11, 4  ;;  %s1946_s7 = sld [smem:[#allocation33_spill]]  ;;  %s315_s17 = int_to_ptr.vmem [resolvable:$true] %s314_s17 }
  0x41   : > { %s1554_s5 = smov [#allocation14]   ;;  %s354_s11 = scalar_lea.hbm %s1903_s0, %s1701_s26 }
  0x42   : > { %s328_s28 = sshll.u32 %s1554_s5, 4  ;;  %s349_s27 = scalar_lea.vmem [#allocation2], %s1698_s25  ;;  %s329_s28 = int_to_ptr.vmem [resolvable:$true] %s328_s28 }
  0x43   : > { %s357_s4 = sshll.u32 %s349_s27, 4  ;;  %s1378_s5 = scalar_lea.hbm %s1903_s0, 16  ;;  %s358_s4 = int_to_ptr.vmem [resolvable:$true] %s357_s4 }
  0x45   : > { %s312_s16 = sshll.u32 %s1945_s6, 4  ;;  %s355_s6 = sshll.u32 %s354_s11, 4  ;;  %s313_s16 = int_to_ptr.hbm [resolvable:$true] %s312_s16  ;;  %s356_s6 = int_to_ptr.hbm [resolvable:$true] %s355_s6 }
  0x46   : > { %s326_s1 = sshll.u32 %s1946_s7, 4  ;;  %s327_s1 = int_to_ptr.hbm [resolvable:$true] %s326_s1 }
  0x47   : > { %1142 = dma.hbm_to_vmem [thread:$0]  (!%p1657_p10), %s313_s16, 128, %s315_s17, [#allocation12], %s1944_s30, %s1944_s30, %s1943_s14  }
  0x48   : > { %1145 = dma.hbm_to_vmem [thread:$0]  (!%p1657_p10), %s327_s1, 256, %s329_s28, [#allocation15], %s1944_s30, %s1944_s30, %s1943_s14  }
  0x49   : > { %s346_s16 = scalar_lea.sflag [#allocation3], %s1695_s24  ;;  %s1371_s17 = sshra.s32 %s356_s6, 4  ;;  %s1372_s17 = int_to_ptr.hbm [resolvable:$true] %s1371_s17 }
  0x4a   : > { %s1373_s7 = scalar_lea.hbm %s1372_s17, 8  ;;  %p1379_p10 = scmp.lt.s32.totalorder %s1372_s17, %s1903_s0 }
  0x4b   : > { %p1374_p1 = scmp.ne.s32.totalorder %s1372_s17, %s1373_s7  ;;  %p1380_p13 = scmp.lt.s32.totalorder %s1378_s5, %s1373_s7 }
  0x4d   : > { %p1376_p11 = pnand %p1374_p1, %p1285_p12  ;;  %p1381_p0 = por %p1380_p13, %p1379_p10 }
  0x4f   : > { %p1377_p2 = pneg %p1376_p11 }
  0x51   : > { %p1382_p5 = pnand %p1381_p0, %p1377_p2 }
  0x53   : > { %1385 = shalt.err (!%p1382_p5)
}
  0x54   : > { %1149 = dma.hbm_to_vmem [thread:$0]  (!%p1703_p9), %s356_s6, 128, %s358_s4, %s346_s16, %s1944_s30, %s1944_s30, %s1943_s14  }
  0x55   : > { %s398_s27 = scalar_lea.hbm %s1905_s2, %s1701_s26  ;;  %s393_s23 = scalar_lea.vmem [#allocation7], %s1698_s25 }
  0x56   : > { %s401_s1 = sshll.u32 %s393_s23, 4  ;;  %s399_s17 = sshll.u32 %s398_s27, 4  ;;  %s402_s1 = int_to_ptr.vmem [resolvable:$true] %s401_s1  ;;  %s400_s17 = int_to_ptr.hbm [resolvable:$true] %s399_s17 }
  0x57   : > { %s1401_s7 = sshra.s32 %s400_s17, 4  ;;  %s1408_s6 = scalar_lea.hbm %s1905_s2, 16  ;;  %s1402_s7 = int_to_ptr.hbm [resolvable:$true] %s1401_s7 }
  0x58   : > { %s1403_s5 = scalar_lea.hbm %s1402_s7, 8  ;;  %p1409_p2 = scmp.lt.s32.totalorder %s1402_s7, %s1905_s2 }
  0x59   : > { %p1404_p7 = scmp.ne.s32.totalorder %s1402_s7, %s1403_s5  ;;  %p1410_p10 = scmp.lt.s32.totalorder %s1408_s6, %s1403_s5 }
  0x5b   : > { %p1406_p1 = pnand %p1404_p7, %p1285_p12  ;;  %p1411_p13 = por %p1410_p10, %p1409_p2 }
  0x5d   : > { %p1407_p11 = pneg %p1406_p1 }
  0x5f   : > { %p1412_p0 = pnand %p1411_p13, %p1407_p11 }
  0x61   : > { %1415 = shalt.err (!%p1412_p0)
}
  0x62   : > { %1155 = dma.hbm_to_vmem [thread:$0]  (!%p1703_p9), %s400_s17, 128, %s402_s1, %s1715_s22, %s1944_s30, %s1944_s30, %s1943_s14  }
  0x63   : > { %s1039_s25 = sshll.u32 %s1695_s24, 1  ;;  %s1040_s26 = sshll.u32 %s1547_s12, 1 }
  0x64   : > { %s419_s27 = scalar_lea.hbm %s1906_s3, %s1040_s26  ;;  %s415_s7 = scalar_lea.vmem [#allocation8], %s1039_s25 }
  0x65   : > { %s421_s23 = sshll.u32 %s419_s27, 4  ;;  %s423_s5 = sshll.u32 %s415_s7, 4  ;;  %s422_s23 = int_to_ptr.hbm [resolvable:$true] %s421_s23  ;;  %s424_s5 = int_to_ptr.vmem [resolvable:$true] %s423_s5 }
  0x66   : > { %s1947_s28 = sand.u32 1, %s1547_s12   ;;  %s1431_s6 = sshra.s32 %s422_s23, 4  ;;  %s1432_s6 = int_to_ptr.hbm [resolvable:$true] %s1431_s6 }
  0x67   : > { %s412_s21 = scalar_lea.sflag [#allocation9], %s1947_s28  ;;  %s1433_s4 = scalar_lea.hbm %s1432_s6, 2 }
  0x68   : > { %p1434_p5 = scmp.ne.s32.totalorder %s1432_s6, %s1433_s4  ;;  %s1438_s24 = scalar_lea.hbm %s1906_s3, 4 }
  0x69   : > { %p1439_p11 = scmp.lt.s32.totalorder %s1432_s6, %s1906_s3  ;;  %p1440_p2 = scmp.lt.s32.totalorder %s1438_s24, %s1433_s4 }
  0x6a   : > { %p1436_p7 = pnand %p1434_p5, %p1285_p12 }
  0x6b   : > { %p1441_p10 = por %p1440_p2, %p1439_p11 }
  0x6c   : > { %p1437_p1 = pneg %p1436_p7 }
  0x6e   : > { %p1442_p13 = pnand %p1441_p10, %p1437_p1 }
  0x70   : > { %1445 = shalt.err (!%p1442_p13)
}
  0x71   : > { %1158 = dma.hbm_to_vmem [thread:$0]  (!%p1703_p9), %s422_s23, 32, %s424_s5, %s412_s21  }
  0x72   : > { %432 = sbr.rel (%p1649_p8) target bundleno = 952 (0x3b8), region = 56  ;;  %s1811_s17 = sand.u32 (!%p1649_p8), 1, %s1539_s10  }
  0x73   : > { %s1814_s16 = sshll.u32 (!%p1649_p8), %s1811_s17, 3  ;;  %s435_s25 = scalar_lea.sflag (!%p1649_p8), [#allocation3], %s1811_s17 }
  0x74   : > { %s438_s26 = scalar_lea.vmem (!%p1649_p8), [#allocation2], %s1814_s16 }
  0x77   : > { %1506 = dma.done.wait (%p1636_p4), %s435_s25, 128  }
  0x78   : > { %1508 = vsyncadd (%p1636_p4), %s435_s25, 4294967168  ;;  %s444_s20 = sand.u32 1, %s1627_s13   ;;  %s448_s18 = scalar_lea.vmem [#allocation5], %s1814_s16 }
  0x79   : > { %s445_s29 = scalar_lea.sflag [#allocation6], %s444_s20 }
  0x7a   : > { %1510 = dma.done.wait (%p1636_p4), %s445_s29, 256  }
  0x7b   : > { %1512 = vsyncadd (%p1636_p4), %s445_s29, 4294967040  ;;  %s1045_s11 = sshll.u32 %s1811_s17, 1  ;;  %s458_s27 = scalar_lea.vmem [#allocation7], %s1814_s16 }
  0x7c   : > { %s465_s23 = scalar_lea.sflag [#allocation9], %s444_s20  ;;  %s1830_s7 = scalar_lea.vmem [#allocation8], %s1045_s11 }
  0x7d   : > { %1514 = dma.done.wait (%p1636_p4), %s465_s23, 32  }
  0x7e   : > { %1516 = vsyncadd (%p1636_p4), %s465_s23, 4294967264  ;;  %p1948_p8 = scmp.eq.s32.totalorder %s1627_s13, 0 }
  0x80   : > { %1518 = dma.done.wait (%p1948_p8), [#allocation9], 128   ;;  %p1949_p9 = pmov %p1948_p8 }
  0x81   : > { %p1950_p12 = pmov %p1948_p8 }
  0x82   : > { %1520 = vsyncadd (%p1949_p9), [#allocation9], 4294967168 }
  0x83   : > { %1522 = dma.done.wait (%p1950_p12), [#allocation12], 256   ;;  %p1951_p0 = pmov %p1948_p8 }
  0x85   : > { %1524 = vsyncadd (%p1951_p0), [#allocation12], 4294967040  ;;  %p1952_p5 = pmov %p1951_p0 }
  0x86   : > { %p1953_p7 = pmov %p1951_p0 }
  0x87   : > { %1526 = dma.done.wait (%p1952_p5), [#allocation15], 256  }
  0x88   : > { %1528 = vsyncadd (%p1953_p7), [#allocation15], 4294967040  ;;  %v1103_v0 = vld [vmem:[#allocation11] sm:$0xff]  ;;  %v1104_v1 = vld [vmem:[#allocation13] sm:$0xff]  ;;  %vm559_vm0 = vcmask 130048   ;;  %vm740_vm1 = vcmask 1043456  }
  0x89   : > { %v1100_v2 = vld [vmem:[%s448_s18] sm:$0xff]  ;;  %v1101_v3 = vld [vmem:[%s458_s27] sm:$0xff]  ;;  %600 = vmatpush.bf16.msra.mxu1 %v1103_v0  ;;  %630 = vmatpush.bf16.msra.mxu2 %v1104_v1  ;;  %v1555_v26 = vmov 0.0   ;;  %vm684_vm3 = vcmask 64512   ;;  %s1093_s15 = sshll.u32 %s1627_s13, 3  ;;  %s538_s30 = scalar_lea.vmem [#allocation16], %s1814_s16 }
  0x8a   : > { %v1102_v4 = vld [vmem:[#allocation10] sm:$0xff]  ;;  %v1099_v5 = vld [vmem:[%s438_s26] sm:$0xff]  ;;  %v637_v22 = vld [vmem:[%s1830_s7] sm:$0x3]  ;;  %s844_s21 = scalar_lea.hbm %s1912_s9, %s1093_s15  ;;  %s846_s22 = sshll.u32 %s538_s30, 4  ;;  %vm831_vm12 = vcmask 261120   ;;  %s847_s22 = int_to_ptr.vmem [resolvable:$true] %s846_s22 }
  0x8b   : > { %570 = vmatpush.bf16.msra.mxu0 %v1102_v4  ;;  %v638_v23 = vunpack.c.0.s8 %v637_v22  ;;  %v1106_v45 = vld [vmem:[#allocation14 + $0x8] sm:$0xff]  ;;  %s848_s24 = sshll.u32 %s844_s21, 4  ;;  %s834_s13 = scalar_lea.sflag [#allocation4], %s1811_s17  ;;  %s849_s24 = int_to_ptr.hbm [resolvable:$true] %s848_s24 }
  0x8c   : > { %1068 = vmatmul.msk.bf16.vlgmr.msra.gmra.mxu1 %vm559_vm0, %v1100_v2  ;;  %1077 = vmatmul.msk.bf16.vlgmr.msra.gmra.mxu2 %vm559_vm0, %v1101_v3  ;;  %s1475_s14 = sshra.s32 %s849_s24, 4  ;;  %s1481_s16 = scalar_lea.hbm %s1912_s9, 16  ;;  %s1476_s14 = int_to_ptr.hbm [resolvable:$true] %s1475_s14 }
  0x8d   : > { %v639_v24 = vcvt.s32.f32 %v638_v23  ;;  %s1477_s1 = scalar_lea.hbm %s1476_s14, 8  ;;  %p1482_p2 = scmp.lt.s32.totalorder %s1476_s14, %s1912_s9 }
  0x8e   : > { %1059 = vmatmul.msk.bf16.vlgmr.msra.gmra.mxu0 %vm559_vm0, %v1099_v5  ;;  %p1478_p4 = scmp.ne.s32.totalorder %s1476_s14, %s1477_s1  ;;  %p1483_p10 = scmp.lt.s32.totalorder %s1481_s16, %s1477_s1 }
  0x8f   : > { %vm640_vm2 = vcmp.eq.f32.partialorder %v639_v24, 0.0 }
  0x90   : > { %v641_v27 = vsel %vm640_vm2, -1e+20, %v1555_v26  ;;  %p1479_p1 = pnand %p1478_p4, %p1686_p3  ;;  %p1484_p13 = por %p1483_p10, %p1482_p2 }
  0x92   : > { %p1480_p11 = pneg %p1479_p1 }
  0x94   : > { %p1485_p8 = pnand %p1484_p13, %p1480_p11 }
 0x109   : > { %v602_v6 = vpop.f32.mrf.mxu1 }
 0x10a   : > { %v644_v7 = vpack.c.bf16 %v602_v6, %v602_v6 }
 0x10b   : > { %v572_v16 = vpop.f32.mrf.mxu0 }
 0x10c   : > { %v650_v8 = vsel %vm559_vm0, %v644_v7, 0  ;;  %v735_v17 = vpack.c.bf16 %v572_v16, %v572_v16  ;;  %v1212_v16 = vld [vmem:[%s1911_s8] ss:$0 sm:$0xff] }
 0x10d   : > { %659 = vmatpush.bf16.xpose.msra.mxu3 %v650_v8  ;;  %v1105_v8 = vld [vmem:[#allocation14] sm:$0xff] }
 0x10e   : > { %v742_v18 = vsel %vm740_vm1, %v735_v17, 0 }
 0x10f   : > { %v632_v9 = vpop.f32.mrf.mxu2  ;;  %751 = vmatpush.bf16.msrb.mxu1 %v742_v18 }
 0x110   : > { %v642_v10 = vpack.c.bf16 %v632_v9, %v632_v9 }
 0x111   : > { %v604_v11 = vpop.f32.mrf.mxu1 }
 0x112   : > { %v645_v12 = vpack.c.bf16 %v604_v11, %v604_v11 }
 0x113   : > { %v574_v19 = vpop.f32.mrf.mxu0 }
 0x114   : > { %1078 = vmatmul.msk.bf16.vlgmr.msra.gmra.mxu3 %vm559_vm0, %v642_v10  ;;  %v669_v13 = vsel %vm559_vm0, %v645_v12, 0  ;;  %v736_v20 = vpack.c.bf16 %v574_v19, %v574_v19 }
 0x115   : > { %678 = vmatpush.bf16.xpose.msrb.mxu0 %v669_v13  ;;  %798 = vmatpush.bf16.msrb.mxu3 %v1106_v45 }
 0x116   : > { %v761_v21 = vsel %vm740_vm1, %v736_v20, 0 }
 0x117   : > { %v634_v14 = vpop.f32.mrf.mxu2  ;;  %770 = vmatpush.bf16.msrb.mxu2 %v761_v21 }
 0x118   : > { %v643_v15 = vpack.c.bf16 %v634_v14, %v634_v14 }
 0x11c   : > { %1079 = vmatmul.msk.bf16.vlgmr.msrb.gmra.mxu0 %vm559_vm0, %v643_v15 }
 0x11d   : > { %820 = vmatpush.bf16.msra.mxu0 %v1105_v8 }
 0x197   : > { %v661_v25 = vpop.f32.mrf.mxu3 }
 0x198   : > { %v662_v32 = vadd.f32 %v661_v25, %v641_v27 }
 0x199   : > { %v680_v28 = vpop.f32.mrf.mxu0 }
 0x19a   : > { %v681_v29 = vadd.f32 %v680_v28, %v641_v27  ;;  %v685_v34 = vsel %vm684_vm3, %v662_v32, -inf }
 0x19c   : > { %v688_v30 = vsel %vm684_vm3, %v681_v29, -inf }
 0x19d   : > { %689 = vmax.xlane.f32.xlu0 %v688_v30 }
 0x19f   : > { %v663_v31 = vpop.f32.mrf.mxu3 }
 0x1a1   : > { %v682_v33 = vpop.f32.mrf.mxu0 }
 0x1a5   : > { %686 = vmax.xlane.f32.xlu0 %v685_v34 }
 0x210   : > { %v690_v35 = vpop.xlane.xlu0 %689 }
 0x211   : > { %v692_v36 = vsub.f32 %v681_v29, %v690_v35 }
 0x213   : > { %v695_v37 = vmul.f32 1.442695, %v692_v36 }
 0x215   : > { %1213 = vpow2.f32 %v695_v37 }
 0x218   : > { %v687_v38 = vpop.xlane.xlu0 %686 }
 0x219   : > { %v691_v39 = vsub.f32 %v662_v32, %v687_v38 }
 0x21b   : > { %v1214_v40 = vpop.eup %1213  ;;  %v693_v41 = vmul.f32 1.442695, %v691_v39 }
 0x21c   : > { %v700_v42 = vsel %vm684_vm3, %v1214_v40, 0.0 }
 0x21d   : > { %1215 = vpow2.f32 %v693_v41  ;;  %701 = vadd.xlane.f32.xlu1 %v700_v42 }
 0x223   : > { %v1216_v43 = vpop.eup %1215 }
 0x224   : > { %v697_v44 = vsel %vm684_vm3, %v1216_v43, 0.0 }
 0x225   : > { %698 = vadd.xlane.f32.xlu1 %v697_v44 }
 0x290   : > { %v702_v46 = vpop.xlane.xlu1 %701 }
 0x291   : > { %1217 = vrcp.f32 %v702_v46  ;;  %v729_v51 = vand.u32 2147483648, %v702_v46  ;;  %v727_v53 = vand.u32 2147483647, %v702_v46  ;;  %vm723_vm5 = vweird.f32 %v702_v46 }
 0x293   : > { %v730_v56 = vor.u32 1.1754944e-38, %v729_v51  ;;  %vm728_vm7 = vcmp.eq.f32.partialorder %v727_v53, 8.507059e+37 }
 0x297   : > { %v1218_v47 = vpop.eup %1217 }
 0x298   : > { %v719_v48 = vmul.f32 %v1218_v47, %v702_v46  ;;  %v699_v49 = vpop.xlane.xlu1 %698  ;;  %vm724_vm4 = vweird.f32 %v1218_v47 }
 0x299   : > { %1219 = vrcp.f32 %v699_v49  ;;  %vm725_vm6 = vmor %vm723_vm5, %vm724_vm4  ;;  %v714_v62 = vand.u32 2147483648, %v699_v49  ;;  %v712_v0 = vand.u32 2147483647, %v699_v49  ;;  %vm708_vm9 = vweird.f32 %v699_v49 }
 0x29a   : > { %v720_v50 = vsub.f32 1.0, %v719_v48 }
 0x29b   : > { %v715_v3 = vor.u32 1.1754944e-38, %v714_v62  ;;  %vm713_vm11 = vcmp.eq.f32.partialorder %v712_v0, 8.507059e+37 }
 0x29c   : > { %v721_v52 = vmul.f32 %v1218_v47, %v720_v50 }
 0x29e   : > { %v722_v54 = vadd.f32 %v1218_v47, %v721_v52 }
 0x29f   : > { %v1220_v55 = vpop.eup %1219 }
 0x2a0   : > { %v704_v57 = vmul.f32 %v1220_v55, %v699_v49  ;;  %v726_v58 = vsel %vm725_vm6, %v1218_v47, %v722_v54  ;;  %vm709_vm8 = vweird.f32 %v1220_v55 }
 0x2a1   : > { %v731_v59 = vsel %vm728_vm7, %v730_v56, %v726_v58  ;;  %vm710_vm10 = vmor %vm708_vm9, %vm709_vm8 }
 0x2a2   : > { %v705_v60 = vsub.f32 1.0, %v704_v57  ;;  %v732_v61 = vmul.f32 %v1214_v40, %v731_v59 }
 0x2a4   : > { %v706_v63 = vmul.f32 %v1220_v55, %v705_v60  ;;  %v734_v1 = vpack.c.bf16 %v732_v61, %v732_v61 }
 0x2a6   : > { %v707_v2 = vadd.f32 %v1220_v55, %v706_v63  ;;  %1081 = vmatmul.msk.bf16.vlgmr.msrb.gmra.mxu2 %vm684_vm3, %v734_v1 }
 0x2a8   : > { %v711_v4 = vsel %vm710_vm10, %v1220_v55, %v707_v2 }
 0x2a9   : > { %v716_v5 = vsel %vm713_vm11, %v715_v3, %v711_v4 }
 0x2aa   : > { %v717_v6 = vmul.f32 %v1216_v43, %v716_v5 }
 0x2ac   : > { %v733_v7 = vpack.c.bf16 %v717_v6, %v717_v6 }
 0x2ae   : > { %1080 = vmatmul.msk.bf16.vlgmr.msrb.gmra.mxu1 %vm684_vm3, %v733_v7 }
 0x329   : > { %v772_v9 = vpop.f32.mrf.mxu2 }
 0x32a   : > { %v781_v10 = vpack.c.bf16 %v772_v9, %v772_v9 }
 0x32b   : > { %v753_v11 = vpop.f32.mrf.mxu1 }
 0x32c   : > { %v780_v12 = vpack.c.bf16 %v753_v11, %v753_v11  ;;  %1086 = vmatmul.msk.bf16.vlgmr.msrb.gmra.mxu3 %vm559_vm0, %v781_v10 }
 0x32e   : > { %1091 = vmatmul.msk.bf16.vlgmr.msra.gmra.mxu0 %vm559_vm0, %v780_v12 }
 0x331   : > { %v774_v13 = vpop.f32.mrf.mxu2 }
 0x333   : > { %v755_v14 = vpop.f32.mrf.mxu1 }
 0x3ab   : > { %v822_v15 = vpop.f32.mrf.mxu0 }
 0x3af   : > { %v800_v17 = vpop.f32.mrf.mxu3 }
 0x3b0   : > { %v823_v18 = vadd.f32 %v822_v15, %v800_v17 }
 0x3b2   : > { %v830_v19 = vadd.f32 %v1212_v16, %v823_v18 }
 0x3b3   : > { %v824_v20 = vpop.f32.mrf.mxu0 }
 0x3b4   : > { %832 = vst.msk [vmem:[%s538_s30] sm:$0xff] %vm831_vm12, %v830_v19 }
 0x3b5   : > { %1488 = shalt.err (!%p1485_p8)
}
 0x3b6   : > { %1131 = dma.vmem_to_hbm [thread:$0]  (%p1686_p3), %s847_s22, 128, %s849_s24, %s834_s13  }
 0x3b7   : > { %v802_v21 = vpop.f32.mrf.mxu3 }
 0x3b8 PF: > { %s1954_s17 = sld [smem:[#allocation24_spill]]  ;;  %p1956_p9 = scmp.ge.s32.totalorder %s1547_s12, 2 }
 0x3ba   : > { %p1160_p12 = pnand %p1956_p9, %p1641_p6 }
 0x3bc   : > { %p1161_p0 = pneg %p1160_p12 }
 0x3be   : > { %s860_s11 = sand.u32 1, %s1954_s17  }
 0x3bf   : > { %s861_s27 = scalar_lea.sflag [#allocation4], %s860_s11 }
 0x3c0   : > { %1530 = dma.done.wait (%p1161_p0), %s861_s27, 128  }
 0x3c1   : > { %1532 = vsyncadd (%p1161_p0), %s861_s27, 4294967168  ;;  %s1957_s12 = sld [smem:[#allocation27_spill]]  ;;  %s1960_s30 = smov %s1539_s10 }
 0x3c2   : > { %s1958_s23 = sld [smem:[#allocation25_spill]] }
 0x3c3   : > { %s1959_s11 = sld [smem:[#allocation28_spill]] }
 0x3c7   : > { %p30_p5 = scmp.ge.s32.totalorder %s1957_s12, 4  }
 0x3c8   : > { %s1961_s10 = smov %s1958_s23 }
 0x3c9   :  { %32 = sbr.rel (!%p30_p5) target bundleno = 17 (0x11), region = 154 }
 0x3ce   :  { %867 = vsyncpa [#allocation3], 1 }
 0x3cf   :  { %869 = vsyncpa [#allocation3 + $0x1], 1 }
 0x3d0   :  { %870 = vsyncpa [#allocation6], 1 }
 0x3d1   :  { %872 = vsyncpa [#allocation6 + $0x1], 1 }
 0x3d2   :  { %873 = vsyncpa [#allocation9], 1 }
 0x3d3   :  { %875 = vsyncpa [#allocation9 + $0x1], 1 }
 0x3d4   :  { %876 = vsyncpa [#allocation12], 1 }
 0x3d5   :  { %877 = vsyncpa [#allocation15], 1 }
 0x3d6   :  { %878 = vsyncpa [#allocation4], 1 }
 0x3d7   :  { %880 = vsyncpa [#allocation4 + $0x1], 1 }

</bundles_post_ra>
